<compile_context>
chip_gen: v7x
topology: tpu7x:2x2x1
jax: 0.10.0
libtpu: 0.0.40
codegen_flags: <defaults>
</compile_context>

<pallas_src>
import functools

import jax
import jax.numpy as jnp
from jax.experimental import pallas as pl
from jax.experimental.pallas import tpu as pltpu

K_IN = 900          # 30 * 30 flattened image features (lin1 fan-in)


def _round_up(n, m):
    return ((n + m - 1) // m) * m


def _pick_tm(g):
    """Row-tile size for the batch/graph axis.

    g <= 256 : one full-extent tile (legal for any g when block == array dim;
               zero padding, zero wasted rows).
    g  > 256 : >= 2 grid steps so v7x's second TensorCore gets work; tile is a
               multiple of 8, capped at 512 rows.  A ragged last tile is handled
               by Pallas boundary blocks (rows are independent; partial output
               blocks only write back the valid rows).
    """
    if g <= 256:
        return g
    return min(512, _round_up(pl.cdiv(g, 2), 8))


def _lin_leakyrelu_kernel(x_ref, wt_ref, b_ref, o_ref):
    # x_ref : (TM, 900) f32    wt_ref : (900, H_PAD)   (resident across grid)
    # b_ref : (1, H_PAD) f32   o_ref  : (TM, H_PAD) f32
    # Cast the activation tile to the weight dtype inside the kernel (free VPU
    # slots), instead of a separate wrapper-side cast pass over HBM.  No-op for
    # an f32 weight slab.
    x = x_ref[...].astype(wt_ref.dtype)
    y = jnp.dot(x, wt_ref[...], preferred_element_type=jnp.float32)
    y = y + b_ref[...]                         # bias broadcast over rows (f32)
    # F.leaky_relu with default negative_slope = 0.01
    o_ref[...] = jnp.where(y > 0, y, 0.01 * y).astype(o_ref.dtype)


def prepare_lin1_params(lin1_weight, lin1_bias, compute_dtype=jnp.bfloat16):
    """One-time parameter prep (do NOT call per forward pass).

    lin1_weight : (n_hidden, 900) PyTorch nn.Linear layout
    lin1_bias   : (n_hidden,)
    Returns (wt, b) with
      wt : (900, H_PAD) = weight.T, hidden dim zero-padded to a multiple of 128
                          (lane-dense output stores), in compute_dtype
                          (bf16 default: half the resident-weight DMA/VMEM,
                          full MXU rate on all generations incl. v5e).
      b  : (1, H_PAD)   = zero-padded bias in float32 (added post-accumulation).
    """
    h = lin1_weight.shape[0]
    h_pad = _round_up(max(h, 1), 128)
    wt = jnp.zeros((K_IN, h_pad), compute_dtype)
    wt = wt.at[:, :h].set(lin1_weight.T.astype(compute_dtype))
    b = jnp.zeros((1, h_pad), jnp.float32)
    b = b.at[0, :h].set(lin1_bias.astype(jnp.float32))
    return wt, b


@functools.partial(jax.jit, static_argnames=("n_hidden",))
def gcn_image_forward(image, wt, b, n_hidden):
    """Forward pass of GCN with input_type='image'.

    image : (num_graphs, 1, 30, 30)
    wt    : (900, H_PAD)  pre-transposed / hidden-padded lin1 weight
    b     : (1, H_PAD)    padded lin1 bias (float32)
    returns : (num_graphs, n_hidden) float32
    """
    g = image.shape[0]
    h_pad = wt.shape[1]

    # return_embeddings + squeeze(1).flatten(1,2) -> (G, 900).  Pure reshape:
    # no pad, no dtype cast, no extra HBM pass.
    a = image.reshape(g, K_IN)

    tm = _pick_tm(g)
    grid = pl.cdiv(g, tm)

    itemsize = jnp.dtype(wt.dtype).itemsize
    cost = pl.CostEstimate(
        flops=2 * g * K_IN * h_pad,
        transcendentals=0,
        bytes_accessed=(g * K_IN * 4                 # x (f32, read once)
                        + K_IN * h_pad * itemsize    # resident weight
                        + h_pad * 4                  # bias
                        + g * h_pad * 4),            # f32 output
    )

    out = pl.pallas_call(
        _lin_leakyrelu_kernel,
        out_shape=jax.ShapeDtypeStruct((g, h_pad), jnp.float32),
        grid_spec=pl.GridSpec(
            grid=(grid,),
            in_specs=[
                pl.BlockSpec((tm, K_IN), lambda i: (i, 0)),      # x tile, full K
                pl.BlockSpec((K_IN, h_pad), lambda i: (0, 0)),   # weight resident
                pl.BlockSpec((1, h_pad), lambda i: (0, 0)),      # bias resident
            ],
            out_specs=pl.BlockSpec((tm, h_pad), lambda i: (i, 0)),
        ),
        compiler_params=pltpu.CompilerParams(
            dimension_semantics=("parallel",),  # independent rows; shards across v7x TCs
        ),
        cost_estimate=cost,
    )(a, wt, b)

    # Strip the lane padding of the hidden dim only (no row padding was added).
    return out[:, :n_hidden]


if __name__ == "__main__":
    # Small, deterministic setup consistent with the module's forward.
    num_graphs = 2          # batch (num_graphs)
    n_hidden = 32           # n_hidden (input_type='image' -> not halved)

    key = jax.random.PRNGKey(0)
    k_img, k_w, k_b = jax.random.split(key, 3)

    # data.image: total elements must equal num_graphs * 900 (= G,1,30,30)
    image = jax.random.normal(k_img, (num_graphs, 1, 30, 30), dtype=jnp.float32)

    # nn.Linear(900, n_hidden) parameters, PyTorch-like uniform init.
    bound = 1.0 / jnp.sqrt(900.0)
    lin1_weight = jax.random.uniform(
        k_w, (n_hidden, 900), minval=-bound, maxval=bound, dtype=jnp.float32)
    lin1_bias = jax.random.uniform(
        k_b, (n_hidden,), minval=-bound, maxval=bound, dtype=jnp.float32)

    # Plain-JAX reference (same math as torch Linear + leaky_relu).
    ref = image.reshape(num_graphs, 900) @ lin1_weight.T + lin1_bias
    ref = jnp.where(ref > 0, ref, 0.01 * ref)

    # ---- bf16-weight path (default: best DMA/MXU behaviour on v5e/v6e/v7x) ----
    wt_bf16, b_bf16 = prepare_lin1_params(lin1_weight, lin1_bias)   # bf16 default
    out_bf16 = gcn_image_forward(image, wt_bf16, b_bf16, n_hidden)
    out_bf16 = jax.block_until_ready(out_bf16)
    assert out_bf16.shape == (num_graphs, n_hidden)
    assert jnp.allclose(out_bf16, ref, atol=5e-2), "bf16 mismatch vs reference"

    # ---- f32 path (exact check of the kernel math) ----
    wt_f32, b_f32 = prepare_lin1_params(lin1_weight, lin1_bias, jnp.float32)
    out_f32 = gcn_image_forward(image, wt_f32, b_f32, n_hidden)
    out_f32 = jax.block_until_ready(out_f32)
    assert out_f32.shape == (num_graphs, n_hidden)
    assert jnp.allclose(out_f32, ref, atol=1e-3), "f32 mismatch vs reference"

    print("KERNEL_OK")
</pallas_src>

<mosaic_0001>
module attributes {stable_mosaic.version = 11 : i64} {
  func.func @_lin_leakyrelu_kernel(%arg0: i32, %arg1: memref<2x900xf32, #tpu.memory_space<vmem>>, %arg2: memref<900x128xbf16, #tpu.memory_space<vmem>>, %arg3: memref<1x128xf32, #tpu.memory_space<vmem>>, %arg4: memref<2x128xf32, #tpu.memory_space<vmem>>) attributes {dimension_semantics = [#tpu.dimension_semantics<parallel>], iteration_bounds = array<i64: 1>, scalar_prefetch = 0 : i64, scratch_operands = 0 : i64, tpu.core_type = #tpu.core_type<tc>, window_params = [{transform_indices = @transform_0, window_bounds = array<i64: 2, 900>}, {pipeline_mode = #tpu.pipeline_mode<synchronous>, transform_indices = @transform_1, window_bounds = array<i64: 900, 128>}, {pipeline_mode = #tpu.pipeline_mode<synchronous>, transform_indices = @transform_2, window_bounds = array<i64: 1, 128>}, {transform_indices = @transform_3, window_bounds = array<i64: 2, 128>}]} {
    %c0 = arith.constant 0 : index
    %c0_0 = arith.constant 0 : index
    %0 = vector.load %arg1[%c0, %c0_0] : memref<2x900xf32, #tpu.memory_space<vmem>>, vector<2x900xf32>
    %1 = arith.truncf %0 : vector<2x900xf32> to vector<2x900xbf16>
    %c0_1 = arith.constant 0 : index
    %c0_2 = arith.constant 0 : index
    %2 = vector.load %arg2[%c0_1, %c0_2] : memref<900x128xbf16, #tpu.memory_space<vmem>>, vector<900x128xbf16>
    %cst = arith.constant dense<0.000000e+00> : vector<2x128xf32>
    %3 = tpu.matmul %1, %2, %cst {dimension_numbers = #tpu.dot_dimension_numbers<[1], [0], [0], [1], [0, 0, 1, 1], [], []>} : vector<2x900xbf16>, vector<900x128xbf16>, vector<2x128xf32> -> vector<2x128xf32>
    %c0_3 = arith.constant 0 : index
    %c0_4 = arith.constant 0 : index
    %4 = vector.load %arg3[%c0_3, %c0_4] : memref<1x128xf32, #tpu.memory_space<vmem>>, vector<1x128xf32>
    %5 = vector.broadcast %4 : vector<1x128xf32> to vector<2x128xf32>
    %6 = arith.addf %3, %5 : vector<2x128xf32>
    %cst_5 = arith.constant 0.000000e+00 : f32
    %7 = vector.broadcast %cst_5 : f32 to vector<2x128xf32>
    %8 = arith.cmpf ogt, %6, %7 : vector<2x128xf32>
    %cst_6 = arith.constant 0.00999999977 : f32
    %9 = vector.broadcast %cst_6 : f32 to vector<2x128xf32>
    %10 = arith.mulf %9, %6 : vector<2x128xf32>
    %11 = arith.select %8, %6, %10 : vector<2x128xi1>, vector<2x128xf32>
    %c0_7 = arith.constant 0 : index
    %c0_8 = arith.constant 0 : index
    %12 = vector.load %arg4[%c0_7, %c0_8] : memref<2x128xf32, #tpu.memory_space<vmem>>, vector<2x128xf32>
    tpu.vector_store %arg4[%c0_7, %c0_8], %11 {strides = array<i32>} : memref<2x128xf32, #tpu.memory_space<vmem>>, vector<2x128xf32>,
    return
  }
  func.func @transform_0(%arg0: i32) -> (i32, i32) {
    %c0_i32 = arith.constant 0 : i32
    %c0_i32_0 = arith.constant 0 : i32
    return %arg0, %c0_i32 : i32, i32
  }
  func.func @transform_1(%arg0: i32) -> (i32, i32) {
    %c0_i32 = arith.constant 0 : i32
    %c0_i32_0 = arith.constant 0 : i32
    %c0_i32_1 = arith.constant 0 : i32
    return %c0_i32, %c0_i32_0 : i32, i32
  }
  func.func @transform_2(%arg0: i32) -> (i32, i32) {
    %c0_i32 = arith.constant 0 : i32
    %c0_i32_0 = arith.constant 0 : i32
    %c0_i32_1 = arith.constant 0 : i32
    return %c0_i32, %c0_i32_0 : i32, i32
  }
  func.func @transform_3(%arg0: i32) -> (i32, i32) {
    %c0_i32 = arith.constant 0 : i32
    %c0_i32_0 = arith.constant 0 : i32
    return %arg0, %c0_i32 : i32, i32
  }
}

</mosaic_0001>

<bundles_post_ra>
// kernel: gcn_image_forward.1
= control target key start
LH: loop header
LB: loop body
LE: loop exit
PB: predicated region body
PF: predicated region fallthrough
CT: control target
= control target key end

     0   :  { %8 = vsyncpa [#allocation3], 0  ;;  %s1042_s0 = inlined_call_operand.vmem [shape: f32[2,900], index: 0, kind: input, shape index: {}]   ;;  %s1043_s1 = inlined_call_operand.hbm [shape: bf16[900,128], index: 1, kind: input, shape index: {}]   ;;  %s1044_s2 = inlined_call_operand.vmem [shape: f32[1,128], index: 2, kind: input, shape index: {}]   ;;  %s1045_s3 = inlined_call_operand.hbm [shape: f32[2,128], index: 3, kind: output, shape index: {}]  }
   0x1   :  { %9 = vsyncpa [#allocation4], 0  ;;  %s968_s12 = smov [#allocation2]   ;;  %s920_s16 = scalar_lea.hbm %s1043_s1, 7232 }
   0x2   :  { %s17_s13 = sshll.u32 %s968_s12, 4  ;;  %p921_p0 = scmp.ne.s32.totalorder %s1043_s1, %s920_s16  ;;  %s18_s13 = int_to_ptr.vmem [resolvable:$true] %s17_s13 }
   0x3   :  { %p924_p1 = scmp.lt.u32.totalorder %s920_s16, %s1043_s1 }
   0x5   :  { %p926_p2 = pnand %p924_p1, %p921_p0 }
   0x7   :  { %929 = shalt.err (!%p926_p2)
}
   0x8   :  { %s930_s21 = scalar_lea.vmem %s18_s13, 7232  ;;  %p935_p4 = scmp.lt.s32.totalorder %s18_s13, %s18_s13 }
   0x9   :  { %p931_p3 = scmp.ne.s32.totalorder %s18_s13, %s930_s21  ;;  %p936_p5 = scmp.lt.s32.totalorder %s930_s21, %s930_s21 }
   0xb   :  { %p937_p6 = por %p936_p5, %p935_p4 }
   0xd   :  { %p938_p7 = pnand %p937_p6, %p931_p3 }
   0xf   :  { %941 = shalt.err (!%p938_p7)
}
  0x10   :  { %s969_s22 = smov 64   ;;  %s970_s23 = smov 4  }
  0x11   :  { %23 = dma.hbm_to_vmem [thread:$0]  %s1043_s1, 7232, %s18_s13, [#allocation3], %s969_s22, %s969_s22, %s970_s23  }
  0x12   :  { %964 = dma.done.wait [#allocation3], 7232  }
  0x13   :  { %965 = vsyncadd [#allocation3], 4294960064  ;;  %v861_v0 = vld [vmem:[#allocation2 + $0x40] sm:$0xff]   ;;  %v865_v4 = vld [vmem:[#allocation2 + $0x48] sm:$0xff]   ;;  %v971_v22 = vmov 1983009808   ;;  %v38_v24 = vlaneseq }
  0x14   :  { %v862_v1 = vld [vmem:[#allocation2 + $0xc0] sm:$0xff]   ;;  %789 = vmatprep.subr.bf16.mxu0 %v861_v0  ;;  %v866_v5 = vld [vmem:[#allocation2 + $0xc8] sm:$0xff]   ;;  %v869_v8 = vld [vmem:[#allocation2 + $0x50] sm:$0xff]   ;;  %v36_v23 = vunpack.c.l.s4 %v971_v22  ;;  %v972_v42 = vmov 0   ;;  %vm543_vm0 = vcmask 31744   ;;  %vm547_vm1 = vcmask 1041408  }
  0x15   :  { %v863_v2 = vld [vmem:[#allocation2] sm:$0xff]   ;;  %811 = vmatprep.subr.bf16.mxu1 %v862_v1  ;;  %v867_v6 = vld [vmem:[#allocation2 + $0x8] sm:$0xff]   ;;  %v870_v9 = vld [vmem:[#allocation2 + $0xd0] sm:$0xff]   ;;  %v39_v30 = vshrl.u32 %v38_v24, 7 }
  0x16   :  { %v864_v3 = vld [vmem:[#allocation2 + $0x80] sm:$0xff]   ;;  %790 = vmatpush3.bf16.msra.mxu0 %v863_v2  ;;  %v868_v7 = vld [vmem:[#allocation2 + $0x88] sm:$0xff]   ;;  %v871_v10 = vld [vmem:[#allocation2 + $0x10] sm:$0xff]   ;;  %v37_v29 = vunpack.c.0.s8 %v36_v23 }
  0x17   :  { %812 = vmatpush3.bf16.msra.mxu1 %v864_v3  ;;  %791 = vmatprep.subr.bf16.mxu0 %v865_v4  ;;  %v872_v11 = vld [vmem:[#allocation2 + $0x90] sm:$0xff]   ;;  %v873_v12 = vld [vmem:[#allocation2 + $0x58] sm:$0xff]   ;;  %v877_v16 = vld [vmem:[#allocation2 + $0x60] sm:$0xff]  }
  0x18   :  { %813 = vmatprep.subr.bf16.mxu1 %v866_v5  ;;  %v874_v13 = vld [vmem:[#allocation2 + $0xd8] sm:$0xff]   ;;  %v878_v17 = vld [vmem:[#allocation2 + $0xe0] sm:$0xff]   ;;  %v881_v20 = vld [vmem:[#allocation2 + $0x68] sm:$0xff]   ;;  %v1006_v35 = vsub.s32 %v37_v29, %v39_v30 }
  0x19   :  { %v875_v14 = vld [vmem:[#allocation2 + $0x18] sm:$0xff]   ;;  %v879_v18 = vld [vmem:[#allocation2 + $0x20] sm:$0xff]   ;;  %v882_v21 = vld [vmem:[#allocation2 + $0xe8] sm:$0xff]  }
  0x1a   :  { %792 = vmatpush3.bf16.msra.mxu0 %v867_v6  ;;  %v876_v15 = vld [vmem:[#allocation2 + $0x98] sm:$0xff]   ;;  %v880_v19 = vld [vmem:[#allocation2 + $0xa0] sm:$0xff]   ;;  %v883_v25 = vld [vmem:[#allocation2 + $0x28] sm:$0xff]  }
  0x1b   :  { %814 = vmatpush3.bf16.msra.mxu1 %v868_v7  ;;  %793 = vmatprep.subr.bf16.mxu0 %v869_v8  ;;  %v884_v26 = vld [vmem:[#allocation2 + $0xa8] sm:$0xff]   ;;  %v885_v27 = vld [vmem:[#allocation2 + $0x70] sm:$0xff]   ;;  %v889_v33 = vld [vmem:[#allocation2 + $0x78] sm:$0xff]  }
  0x1c   :  { %815 = vmatprep.subr.bf16.mxu1 %v870_v9  ;;  %v886_v28 = vld [vmem:[#allocation2 + $0xf0] sm:$0xff]   ;;  %v890_v34 = vld [vmem:[#allocation2 + $0xf8] sm:$0xff]   ;;  %v30_v38 = vld [vmem:[%s1042_s0] sm:$0xff] }
  0x1d   :  { %v887_v31 = vld [vmem:[#allocation2 + $0x30] sm:$0xff]   ;;  %v891_v36 = vld [vmem:[#allocation2 + $0x38] sm:$0xff]   ;;  %v41_v39 = vrot.slane %v30_v38, %v1006_v35  ;;  %v34_v40 = vcombine.high %v30_v38, %v30_v38  ;;  %v894_v41 = vld [vmem:[#allocation2 + $0x140] sm:$0xff]  }
  0x1e   :  { %794 = vmatpush3.bf16.msra.mxu0 %v871_v10  ;;  %v888_v32 = vld [vmem:[#allocation2 + $0xb0] sm:$0xff]   ;;  %v892_v37 = vld [vmem:[#allocation2 + $0xb8] sm:$0xff]   ;;  %v895_v48 = vld [vmem:[#allocation2 + $0x100] sm:$0xff]  }
  0x1f   :  { %816 = vmatpush3.bf16.msra.mxu1 %v872_v11  ;;  %795 = vmatprep.subr.bf16.mxu0 %v873_v12  ;;  %v49_v43 = vcombine.high %v41_v39, %v41_v39  ;;  %v48_v44 = vrot.slane %v34_v40, %v1006_v35  ;;  %v76_v45 = vpack.c.bf16 %v41_v39, %v41_v39  ;;  %v897_v50 = vld [vmem:[#allocation2 + $0x148] sm:$0xff]   ;;  %v896_v52 = vld [vmem:[#allocation2 + $0x180] sm:$0xff]   ;;  %v900_v54 = vld [vmem:[#allocation2 + $0x150] sm:$0xff]  }
  0x20   :  { %817 = vmatprep.subr.bf16.mxu1 %v874_v13  ;;  %v898_v53 = vld [vmem:[#allocation2 + $0x108] sm:$0xff]   ;;  %v901_v56 = vld [vmem:[#allocation2 + $0x110] sm:$0xff]   ;;  %v903_v57 = vld [vmem:[#allocation2 + $0x158] sm:$0xff]  }
  0x21   :  { %v77_v46 = vpack.c.bf16 %v49_v43, %v49_v43  ;;  %v50_v47 = vcombine.high %v48_v44, %v48_v44  ;;  %v78_v49 = vpack.c.bf16 %v48_v44, %v48_v44  ;;  %v899_v55 = vld [vmem:[#allocation2 + $0x188] sm:$0xff]   ;;  %v902_v58 = vld [vmem:[#allocation2 + $0x190] sm:$0xff]   ;;  %v904_v59 = vld [vmem:[#allocation2 + $0x118] sm:$0xff]  }
  0x22   :  { %796 = vmatpush3.bf16.msra.mxu0 %v875_v14  ;;  %v906_v60 = vld [vmem:[#allocation2 + $0x160] sm:$0xff]   ;;  %v905_v61 = vld [vmem:[#allocation2 + $0x198] sm:$0xff]   ;;  %v909_v63 = vld [vmem:[#allocation2 + $0x168] sm:$0xff]  }
  0x23   :  { %818 = vmatpush3.bf16.msra.mxu1 %v876_v15  ;;  %797 = vmatprep.subr.bf16.mxu0 %v877_v16  ;;  %v79_v51 = vpack.c.bf16 %v50_v47, %v50_v47  ;;  %v907_v62 = vld [vmem:[#allocation2 + $0x120] sm:$0xff]   ;;  %v31_v1 = vld [vmem:[%s1042_s0 + $0x8] sm:$0xff]  ;;  %v912_v5 = vld [vmem:[#allocation2 + $0x170] sm:$0xff]  }
  0x24   :  { %819 = vmatprep.subr.bf16.mxu1 %v878_v17  ;;  %583 = vmatprep.mubr.bf16.mxu0 %v77_v46  ;;  %v908_v0 = vld [vmem:[#allocation2 + $0x1a0] sm:$0xff]   ;;  %v910_v2 = vld [vmem:[#allocation2 + $0x128] sm:$0xff]   ;;  %v51_v3 = vcombine.high %v31_v1, %v31_v1  ;;  %v58_v4 = vrot.slane %v31_v1, %v1006_v35  ;;  %v913_v9 = vld [vmem:[#allocation2 + $0x130] sm:$0xff]  }
  0x25   :  { %623 = vmatprep.mubr.bf16.mxu1 %v79_v51  ;;  %v911_v6 = vld [vmem:[#allocation2 + $0x1a8] sm:$0xff]   ;;  %v915_v12 = vld [vmem:[#allocation2 + $0x178] sm:$0xff]   ;;  %v914_v13 = vld [vmem:[#allocation2 + $0x1b0] sm:$0xff]  }
  0x26   :  { %798 = vmatpush3.bf16.msra.mxu0 %v879_v18  ;;  %v66_v7 = vcombine.high %v58_v4, %v58_v4  ;;  %v65_v8 = vrot.slane %v51_v3, %v1006_v35  ;;  %v916_v15 = vld [vmem:[#allocation2 + $0x138] sm:$0xff]   ;;  %v80_v17 = vpack.c.bf16 %v58_v4, %v58_v4  ;;  %v919_v18 = vld [vmem:[#allocation2 + $0x1c0] ss:$0 sps:$4 sm:$0x33]  }
  0x27   :  { %820 = vmatpush3.bf16.msra.mxu1 %v880_v19  ;;  %799 = vmatprep.subr.bf16.mxu0 %v881_v20  ;;  %v917_v16 = vld [vmem:[#allocation2 + $0x1b8] sm:$0xff]   ;;  %v549_v19 = vsel %vm547_vm1, %v919_v18, 0  ;;  %v730_v22 = vld [vmem:[%s1044_s2] ss:$0 sm:$0xff]  ;;  %s973_s2 = smov [#allocation5]  }
  0x28   :  { %821 = vmatprep.subr.bf16.mxu1 %v882_v21  ;;  %v81_v10 = vpack.c.bf16 %v66_v7, %v66_v7  ;;  %v67_v11 = vcombine.high %v65_v8, %v65_v8  ;;  %v82_v20 = vpack.c.bf16 %v65_v8, %v65_v8  ;;  %s721_s30 = sshll.u32 %s973_s2, 4  ;;  %s722_s30 = int_to_ptr.vmem [resolvable:$true] %s721_s30 }
  0x29   :  { %s942_s4 = scalar_lea.vmem %s722_s30, 32  ;;  %p947_p9 = scmp.lt.s32.totalorder %s722_s30, %s722_s30 }
  0x2a   :  { %800 = vmatpush3.bf16.msra.mxu0 %v883_v25  ;;  %v83_v14 = vpack.c.bf16 %v67_v11, %v67_v11  ;;  %p943_p8 = scmp.ne.s32.totalorder %s722_s30, %s942_s4  ;;  %p948_p10 = scmp.lt.s32.totalorder %s942_s4, %s942_s4 }
  0x2b   :  { %822 = vmatpush3.bf16.msra.mxu1 %v884_v26  ;;  %801 = vmatprep.subr.bf16.mxu0 %v885_v27 }
  0x2c   :  { %823 = vmatprep.subr.bf16.mxu1 %v886_v28  ;;  %p949_p11 = por %p948_p10, %p947_p9 }
  0x2e   :  { %802 = vmatpush3.bf16.msra.mxu0 %v887_v31  ;;  %p950_p12 = pnand %p949_p11, %p943_p8 }
  0x2f   :  { %824 = vmatpush3.bf16.msra.mxu1 %v888_v32  ;;  %803 = vmatprep.subr.bf16.mxu0 %v889_v33 }
  0x30   :  { %825 = vmatprep.subr.bf16.mxu1 %v890_v34 }
  0x32   :  { %804 = vmatpush3.bf16.msra.mxu0 %v891_v36 }
  0x33   :  { %826 = vmatpush3.bf16.msra.mxu1 %v892_v37  ;;  %833 = vmatprep.subr.bf16.mxu0 %v894_v41 }
  0x34   :  { %671 = vmatprep.subr.bf16.mxu1 %v972_v42 }
  0x35   :  { %584 = vmatmul.mubr.bf16.vlgmr.msra.gmra.mrb[0].mxu0 %v76_v45 }
  0x36   :  { %834 = vmatpush3.bf16.msra.mxu0 %v895_v48  ;;  %624 = vmatmul.mubr.bf16.vlgmr.msra.gmra.mrb[0].mxu1 %v78_v49 }
  0x37   :  { %835 = vmatprep.subr.bf16.mxu0 %v897_v50  ;;  %672 = vmatpush1.bf16.msra.mxu1 %v896_v52 }
  0x38   :  { %673 = vmatprep.subr.bf16.mxu1 %v972_v42  ;;  %663 = vmatprep.mubr.bf16.mxu0 %v81_v10 }
  0x39   :  { %788 = vmatprep.mubr.msk.bf16.mxu1 %vm543_vm0, %v83_v14 }
  0x3a   :  { %836 = vmatpush3.bf16.msra.mxu0 %v898_v53 }
  0x3b   :  { %837 = vmatprep.subr.bf16.mxu0 %v900_v54  ;;  %674 = vmatpush1.bf16.msra.mxu1 %v899_v55 }
  0x3c   :  { %675 = vmatprep.subr.bf16.mxu1 %v972_v42 }
  0x3e   :  { %838 = vmatpush3.bf16.msra.mxu0 %v901_v56 }
  0x3f   :  { %839 = vmatprep.subr.bf16.mxu0 %v903_v57  ;;  %676 = vmatpush1.bf16.msra.mxu1 %v902_v58 }
  0x40   :  { %677 = vmatprep.subr.bf16.mxu1 %v972_v42 }
  0x42   :  { %840 = vmatpush3.bf16.msra.mxu0 %v904_v59 }
  0x43   :  { %841 = vmatprep.subr.bf16.mxu0 %v906_v60  ;;  %678 = vmatpush1.bf16.msra.mxu1 %v905_v61 }
  0x44   :  { %679 = vmatprep.subr.bf16.mxu1 %v972_v42 }
  0x46   :  { %842 = vmatpush3.bf16.msra.mxu0 %v907_v62 }
  0x47   :  { %843 = vmatprep.subr.bf16.mxu0 %v909_v63  ;;  %680 = vmatpush1.bf16.msra.mxu1 %v908_v0 }
  0x48   :  { %681 = vmatprep.subr.bf16.mxu1 %v972_v42 }
  0x4a   :  { %844 = vmatpush3.bf16.msra.mxu0 %v910_v2 }
  0x4b   :  { %845 = vmatprep.subr.bf16.mxu0 %v912_v5  ;;  %682 = vmatpush1.bf16.msra.mxu1 %v911_v6 }
  0x4c   :  { %683 = vmatprep.subr.bf16.mxu1 %v972_v42 }
  0x4e   :  { %846 = vmatpush3.bf16.msra.mxu0 %v913_v9 }
  0x4f   :  { %847 = vmatprep.subr.bf16.mxu0 %v915_v12  ;;  %684 = vmatpush1.bf16.msra.mxu1 %v914_v13 }
  0x50   :  { %685 = vmatprep.subr.bf16.mxu1 %v972_v42 }
  0x52   :  { %848 = vmatpush3.bf16.msra.mxu0 %v916_v15 }
  0x53   :  { %686 = vmatpush1.bf16.msra.mxu1 %v917_v16 }
  0x54   :  { %687 = vmatprep.subr.bf16.mxu1 %v972_v42 }
  0x55   :  { %664 = vmatmul.mubr.bf16.vlgmr.msra.gmra.mrb[4].mxu0 %v80_v17 }
  0x57   :  { %688 = vmatpush1.bf16.msra.mxu1 %v549_v19 }
  0x5a   :  { %704 = vmatmul.mubr.bf16.vlgmr.msra.gmra.mrb[4].mxu1 %v82_v20 }
 0x108   :  { %v805_v21 = vpop.f32.mrb[0].mxu0 }
 0x109   :  { %v806_v23 = vpop.f32.mrb[1].mxu0  ;;  %v827_v24 = vpop.f32.mrb[0].mxu1 }
 0x10a   :  { %v807_v25 = vadd.f32 %v806_v23, %v805_v21  ;;  %v808_v26 = vpop.f32.mrb[2].mxu0  ;;  %v828_v27 = vpop.f32.mrb[1].mxu1 }
 0x10b   :  { %v809_v28 = vpop.f32.mrb[3].mxu0  ;;  %v829_v30 = vadd.f32 %v828_v27, %v827_v24  ;;  %v830_v31 = vpop.f32.mrb[2].mxu1 }
 0x10c   :  { %v586_v29 = vadd.f32 %v807_v25, %v730_v22  ;;  %v831_v32 = vpop.f32.mrb[3].mxu1 }
 0x10e   :  { %v626_v33 = vadd.f32 %v829_v30, %v586_v29 }
 0x128   :  { %v849_v34 = vpop.f32.mrb[4].mxu0 }
 0x129   :  { %v850_v35 = vpop.f32.mrb[5].mxu0 }
 0x12a   :  { %v851_v36 = vadd.f32 %v850_v35, %v849_v34  ;;  %v852_v37 = vpop.f32.mrb[6].mxu0 }
 0x12b   :  { %v853_v38 = vpop.f32.mrb[7].mxu0 }
 0x12c   :  { %v666_v39 = vadd.f32 %v851_v36, %v626_v33 }
 0x12d   :  { %v705_v40 = vpop.f32.mrb[4].mxu1 }
 0x12e   :  { %v706_v41 = vadd.f32 %v705_v40, %v666_v39  ;;  %v707_v42 = vpop.f32.mrb[5].mxu1 }
 0x12f   :  { %v708_v43 = vpop.f32.mrb[6].mxu1 }
 0x130   :  { %v712_v44 = vmul.f32 0.01, %v706_v41  ;;  %v709_v45 = vpop.f32.mrb[7].mxu1  ;;  %vm711_vm2 = vcmp.gt.f32.partialorder %v706_v41, 0.0 }
 0x132   :  { %v713_v46 = vsel %vm711_vm2, %v706_v41, %v712_v44 }
 0x133   :  { %714 = vst [vmem:[#allocation5] sm:$0x3] %v713_v46 }
 0x134   :  { %953 = shalt.err (!%p950_p12)
}
 0x135   :  { %s954_s7 = scalar_lea.hbm %s1045_s3, 32 }
 0x136   :  { %p955_p13 = scmp.ne.s32.totalorder %s1045_s3, %s954_s7  ;;  %p958_p0 = scmp.lt.u32.totalorder %s954_s7, %s1045_s3 }
 0x138   :  { %p960_p1 = pnand %p958_p0, %p955_p13 }
 0x13a   :  { %963 = shalt.err (!%p960_p1)
}
 0x13b   :  { %724 = dma.vmem_to_hbm [thread:$0]  %s722_s30, 32, %s1045_s3, [#allocation4]  }
 0x13c   :  { %966 = dma.done.wait [#allocation4], 32  }
 0x13d   :  { %967 = vsyncadd [#allocation4], 4294967264 }
 0x13e   :  { %728 = vsyncpa [#allocation3], 1 }
 0x13f   :  { %729 = vsyncpa [#allocation4], 1 }

</bundles_post_ra>
